<compile_context>
chip_gen: v5e
topology: v5e:2x2
jax: 0.10.0
libtpu: 0.0.40
codegen_flags: <defaults>
</compile_context>

<pallas_src>
import functools

import jax
import jax.numpy as jnp
from jax.experimental import pallas as pl
from jax.experimental.pallas import tpu as pltpu


def _basic_block_kernel(x_ref, w_ref, b_ref, o_ref, *, H, matmul_dtype):
    """One grid step = `images_per_step` images stacked on the M (row) axis.

    x_ref : (M, WC)        lane-dense activations, M = images_per_step * H, WC = W*C
    w_ref : (2, 3*WC, WC)  per-conv K-stacked banded matrices (BN scale folded)
    b_ref : (2, 1, WC)     per-conv folded BN bias, tiled across W
    o_ref : (M, WC)        output
    """
    f32 = jnp.float32
    M, WC = x_ref.shape
    x0 = x_ref[...].astype(f32)

    # Per-image vertical halo masks (periodic in H so several stacked images
    # share one roll): row h==0 has no "up" neighbour, row h==H-1 no "down".
    h = jax.lax.broadcasted_iota(jnp.int32, (M, WC), 0) % H
    top = h == 0
    bot = h == H - 1

    def conv_bn(act, idx):
        # Vertical taps via XLU rolls + halo masking (all aligned, no padded
        # scratch, no sublane-offset slices).  Positive shifts only.
        up = jnp.where(top, 0.0, pltpu.roll(act, shift=1, axis=0))      # pad[h+0]
        dn = jnp.where(bot, 0.0, pltpu.roll(act, shift=M - 1, axis=0))  # pad[h+2]
        # K-stacked LHS: one cast, one matmul with K = 3*WC.
        lhs = jnp.concatenate([up, act, dn], axis=1).astype(matmul_dtype)
        y = jnp.dot(lhs, w_ref[idx], preferred_element_type=f32)        # (M, WC)
        return y + b_ref[idx]                                           # (1, WC) bcast

    # conv1 -> bn1 -> relu
    y1 = jnp.maximum(conv_bn(x0, 0), 0.0)
    # conv2 -> bn2 -> (+identity) -> relu
    y2 = conv_bn(y1, 1)
    o_ref[...] = jnp.maximum(y2 + x0, 0.0).astype(o_ref.dtype)


def _fold_bn(gamma, beta, mean, var, eps):
    scale = (gamma / jnp.sqrt(var + eps)).astype(jnp.float32)
    bias = (beta - mean * scale).astype(jnp.float32)
    return scale, bias


def _fused_conv_matrix(w_oihw, scale, width):
    """Fold a 3x3 / stride-1 / pad-1 conv (+ BN scale) into one (3*W*C, W*C) matrix.

    For an activation row laid out as row[w*C + ci], the conv output row h is
        concat([pad[h+0], pad[h+1], pad[h+2]], axis=-1) @ M
    where `pad` is the vertically zero-padded activation.  Horizontal zero
    padding is realised by the missing out-of-range bands of each dy block.
    """
    # wt[dy, dx, ci, co] = w[co, ci, dy, dx] * scale[co]
    wt = (jnp.transpose(w_oihw, (2, 3, 1, 0)).astype(jnp.float32)
          * scale[None, None, None, :])
    blocks = []
    for dy in range(3):
        m = sum(jnp.kron(jnp.eye(width, k=1 - dx, dtype=jnp.float32), wt[dy, dx])
                for dx in range(3))
        blocks.append(m)
    return jnp.concatenate(blocks, axis=0)                    # (3*W*C, W*C)


def basic_block_forward_nhwc(x_nhwc, w1_oihw, w2_oihw,
                             g1, be1, m1, v1, g2, be2, m2, v2,
                             eps=1e-5, matmul_dtype=jnp.bfloat16,
                             images_per_step=None):
    """Fused BasicBlock forward on NHWC input (preferred layout: no transposes).

    Semantics: conv3x3 -> BN -> ReLU -> conv3x3 -> BN -> (+x) -> ReLU, stride=1,
    identity shortcut.  BatchNorm is eval-mode (running stats folded).
    """
    N, H, W, C = x_nhwc.shape
    if w1_oihw.shape != (C, C, 3, 3) or w2_oihw.shape != (C, C, 3, 3):
        raise ValueError("only the stride=1 / downsample=None BasicBlock "
                         "(identity shortcut, inplanes == planes) is supported")
    WC = W * C
    if WC % 128 != 0 or H % 8 != 0:
        raise ValueError(f"W*C (={WC}) must be a multiple of 128 and H (={H}) a "
                         "multiple of 8 for the lane-dense banded formulation")

    # Images per grid step: default N//2 keeps both v7x TensorCores busy while
    # halving the grid-step count; single-TC v5e/v6e callers can pass
    # images_per_step=N.  Capped so one block stays a modest VMEM tile.
    if images_per_step is None:
        images_per_step = max(1, N // 2)
    images_per_step = max(1, min(int(images_per_step), N, max(1, 1024 // H)))
    while N % images_per_step:
        images_per_step -= 1
    MB = images_per_step * H
    n_steps = N // images_per_step

    s1, b1 = _fold_bn(g1, be1, m1, v1, eps)
    s2, b2 = _fold_bn(g2, be2, m2, v2, eps)
    w_all = jnp.stack([_fused_conv_matrix(w1_oihw, s1, W),
                       _fused_conv_matrix(w2_oihw, s2, W)]).astype(matmul_dtype)
    b_all = jnp.stack([jnp.tile(b1, W), jnp.tile(b2, W)]).reshape(2, 1, WC)

    # (N, H, W, C) -> (N*H, W*C): images stacked contiguously on the M axis.
    x2d = x_nhwc.reshape(N * H, WC).astype(jnp.float32)

    # Right-sized VMEM budget: double-buffered in/out blocks + the (revisited,
    # not re-fetched) weight stack + headroom for the in-register LHS / temps.
    wbytes = int(w_all.size) * jnp.dtype(matmul_dtype).itemsize
    est = 4 * MB * WC * 4 + 2 * wbytes + 4 * 2 * WC * 4 + 8 * MB * 3 * WC * 4
    vmem_limit = int(min(48 * 1024 * 1024, max(8 * 1024 * 1024, 2 * est)))

    kernel = functools.partial(_basic_block_kernel, H=H, matmul_dtype=matmul_dtype)
    out = pl.pallas_call(
        kernel,
        out_shape=jax.ShapeDtypeStruct((N * H, WC), jnp.float32),
        grid=(n_steps,),
        in_specs=[
            pl.BlockSpec((MB, WC), lambda n: (n, 0)),
            pl.BlockSpec((2, 3 * WC, WC), lambda n: (0, 0, 0)),
            pl.BlockSpec((2, 1, WC), lambda n: (0, 0, 0)),
        ],
        out_specs=pl.BlockSpec((MB, WC), lambda n: (n, 0)),
        compiler_params=pltpu.CompilerParams(
            dimension_semantics=("parallel",),
            vmem_limit_bytes=vmem_limit),
    )(x2d, w_all, b_all)
    return out.reshape(N, H, W, C)


def basic_block_forward(x_nchw, w1_oihw, w2_oihw,
                        g1, be1, m1, v1, g2, be2, m2, v2,
                        eps=1e-5, matmul_dtype=jnp.bfloat16,
                        images_per_step=None):
    """PyTorch-convention entry point (NCHW activations, OIHW weights).

    NOTE: the NCHW<->NHWC transposes here are boundary glue (one HBM pass
    each); in a full model keep activations NHWC and call
    basic_block_forward_nhwc directly.
    """
    x_nhwc = jnp.transpose(x_nchw, (0, 2, 3, 1))
    out = basic_block_forward_nhwc(x_nhwc, w1_oihw, w2_oihw,
                                   g1, be1, m1, v1, g2, be2, m2, v2,
                                   eps=eps, matmul_dtype=matmul_dtype,
                                   images_per_step=images_per_step)
    return jnp.transpose(out, (0, 3, 1, 2))


def _reference_forward(x, w1, w2, g1, be1, m1, v1, g2, be2, m2, v2, eps=1e-5):
    """Pure-JAX reference (NCHW/OIHW) for correctness checking."""
    s1 = g1 / jnp.sqrt(v1 + eps)
    b1 = be1 - m1 * s1
    s2 = g2 / jnp.sqrt(v2 + eps)
    b2 = be2 - m2 * s2
    dn = jax.lax.conv_dimension_numbers(x.shape, w1.shape,
                                        ('NCHW', 'OIHW', 'NCHW'))
    y = jax.lax.conv_general_dilated(
        x, w1, (1, 1), ((1, 1), (1, 1)), dimension_numbers=dn,
        precision=jax.lax.Precision.HIGHEST)
    y = y * s1[None, :, None, None] + b1[None, :, None, None]
    y = jnp.maximum(y, 0.0)
    y = jax.lax.conv_general_dilated(
        y, w2, (1, 1), ((1, 1), (1, 1)), dimension_numbers=dn,
        precision=jax.lax.Precision.HIGHEST)
    y = y * s2[None, :, None, None] + b2[None, :, None, None]
    return jnp.maximum(y + x, 0.0)


if __name__ == "__main__":
    # BasicBlock(inplanes=8, planes=8, stride=1); W*C == 128 -> lane-dense tiles.
    N, C, H, W = 2, 8, 16, 16

    key = jax.random.PRNGKey(0)
    ks = jax.random.split(key, 11)

    x = jax.random.normal(ks[0], (N, C, H, W), jnp.float32)
    w1 = 0.1 * jax.random.normal(ks[1], (C, C, 3, 3), jnp.float32)   # OIHW
    w2 = 0.1 * jax.random.normal(ks[2], (C, C, 3, 3), jnp.float32)   # OIHW
    g1 = 0.5 + jax.random.uniform(ks[3], (C,), jnp.float32)
    be1 = 0.1 * jax.random.normal(ks[4], (C,), jnp.float32)
    m1 = 0.1 * jax.random.normal(ks[5], (C,), jnp.float32)
    v1 = 0.5 + jax.random.uniform(ks[6], (C,), jnp.float32)
    g2 = 0.5 + jax.random.uniform(ks[7], (C,), jnp.float32)
    be2 = 0.1 * jax.random.normal(ks[8], (C,), jnp.float32)
    m2 = 0.1 * jax.random.normal(ks[9], (C,), jnp.float32)
    v2 = 0.5 + jax.random.uniform(ks[10], (C,), jnp.float32)

    ref = jax.block_until_ready(
        _reference_forward(x, w1, w2, g1, be1, m1, v1, g2, be2, m2, v2))

    # Default path: bf16 MXU operands, f32 accumulation + f32 elementwise.
    out = jax.block_until_ready(
        basic_block_forward(x, w1, w2, g1, be1, m1, v1, g2, be2, m2, v2))
    assert out.shape == (N, C, H, W)
    if not bool(jnp.allclose(out, ref, atol=5e-2, rtol=5e-2)):
        raise AssertionError("Pallas BasicBlock (bf16 matmul) mismatch vs JAX reference")

    # f32 matmul-operand path: near-exact module semantics.
    out_f32 = jax.block_until_ready(
        basic_block_forward(x, w1, w2, g1, be1, m1, v1, g2, be2, m2, v2,
                            matmul_dtype=jnp.float32))
    if not bool(jnp.allclose(out_f32, ref, atol=1e-2, rtol=1e-2)):
        raise AssertionError("Pallas BasicBlock (f32 matmul) mismatch vs JAX reference")

    # Whole batch folded into one grid step (preferred on single-TC v5e/v6e).
    out_merged = jax.block_until_ready(
        basic_block_forward(x, w1, w2, g1, be1, m1, v1, g2, be2, m2, v2,
                            images_per_step=N))
    if not bool(jnp.allclose(out_merged, ref, atol=5e-2, rtol=5e-2)):
        raise AssertionError("Pallas BasicBlock (batch-merged) mismatch vs JAX reference")

    print("KERNEL_OK")
</pallas_src>

<mosaic_0001>
module attributes {stable_mosaic.version = 11 : i64} {
  func.func @_basic_block_kernel(%arg0: i32, %arg1: memref<16x128xf32, #tpu.memory_space<vmem>>, %arg2: memref<2x384x128xbf16, #tpu.memory_space<vmem>>, %arg3: memref<2x1x128xf32, #tpu.memory_space<vmem>>, %arg4: memref<16x128xf32, #tpu.memory_space<vmem>>) attributes {dimension_semantics = [#tpu.dimension_semantics<parallel>], iteration_bounds = array<i64: 2>, scalar_prefetch = 0 : i64, scratch_operands = 0 : i64, tpu.core_type = #tpu.core_type<tc>, window_params = [{transform_indices = @transform_0, window_bounds = array<i64: 16, 128>}, {pipeline_mode = #tpu.pipeline_mode<synchronous>, transform_indices = @transform_1, window_bounds = array<i64: 2, 384, 128>}, {pipeline_mode = #tpu.pipeline_mode<synchronous>, transform_indices = @transform_2, window_bounds = array<i64: 2, 1, 128>}, {transform_indices = @transform_3, window_bounds = array<i64: 16, 128>}]} {
    %c0 = arith.constant 0 : index
    %c0_0 = arith.constant 0 : index
    %0 = vector.load %arg1[%c0, %c0_0] : memref<16x128xf32, #tpu.memory_space<vmem>>, vector<16x128xf32>
    %1 = tpu.iota {dimensions = array<i32: 0>} : vector<16x128xi32>
    %c16_i32 = arith.constant 16 : i32
    %c0_i32 = arith.constant 0 : i32
    %2 = arith.cmpi eq, %c16_i32, %c0_i32 : i32
    %c1_i32 = arith.constant 1 : i32
    %3 = arith.select %2, %c1_i32, %c16_i32 : i32
    %4 = vector.broadcast %3 : i32 to vector<16x128xi32>
    %5 = arith.remsi %1, %4 : vector<16x128xi32>
    %c0_i32_1 = arith.constant 0 : i32
    %6 = vector.broadcast %c0_i32_1 : i32 to vector<16x128xi32>
    %7 = arith.cmpi ne, %5, %6 : vector<16x128xi32>
    %c0_i32_2 = arith.constant 0 : i32
    %8 = vector.broadcast %c0_i32_2 : i32 to vector<16x128xi32>
    %9 = arith.cmpi slt, %5, %8 : vector<16x128xi32>
    %c0_i32_3 = arith.constant 0 : i32
    %10 = arith.cmpi slt, %3, %c0_i32_3 : i32
    %11 = vector.broadcast %10 : i1 to vector<16x128xi1>
    %12 = vector.broadcast %11 : vector<16x128xi1> to vector<16x128xi1>
    %13 = arith.xori %9, %12 : vector<16x128xi1>
    %14 = arith.andi %13, %7 : vector<16x128xi1>
    %15 = vector.broadcast %3 : i32 to vector<16x128xi32>
    %16 = arith.addi %5, %15 : vector<16x128xi32>
    %17 = arith.select %14, %16, %5 : vector<16x128xi1>, vector<16x128xi32>
    %c0_i32_4 = arith.constant 0 : i32
    %18 = vector.broadcast %c0_i32_4 : i32 to vector<16x128xi32>
    %19 = arith.cmpi eq, %17, %18 : vector<16x128xi32>
    %c15_i32 = arith.constant 15 : i32
    %20 = vector.broadcast %c15_i32 : i32 to vector<16x128xi32>
    %21 = arith.cmpi eq, %17, %20 : vector<16x128xi32>
    %c1_i32_5 = arith.constant 1 : i32
    %22 = tpu.dynamic_rotate %0 by %c1_i32_5 dim 0 : vector<16x128xf32>, i32 -> vector<16x128xf32>
    %cst = arith.constant 0.000000e+00 : f32
    %23 = vector.broadcast %cst : f32 to vector<16x128xf32>
    %24 = arith.select %19, %23, %22 : vector<16x128xi1>, vector<16x128xf32>
    %c15_i32_6 = arith.constant 15 : i32
    %25 = tpu.dynamic_rotate %0 by %c15_i32_6 dim 0 : vector<16x128xf32>, i32 -> vector<16x128xf32>
    %cst_7 = arith.constant 0.000000e+00 : f32
    %26 = vector.broadcast %cst_7 : f32 to vector<16x128xf32>
    %27 = arith.select %21, %26, %25 : vector<16x128xi1>, vector<16x128xf32>
    %28 = tpu.concatenate %24, %0, %27 in 1 : vector<16x128xf32>, vector<16x128xf32>, vector<16x128xf32> -> vector<16x384xf32>
    %29 = arith.truncf %28 : vector<16x384xf32> to vector<16x384xbf16>
    %c0_8 = arith.constant 0 : index
    %c0_9 = arith.constant 0 : index
    %c0_10 = arith.constant 0 : index
    %30 = vector.load %arg2[%c0_8, %c0_9, %c0_10] : memref<2x384x128xbf16, #tpu.memory_space<vmem>>, vector<1x384x128xbf16>
    %31 = vector.shape_cast %30 : vector<1x384x128xbf16> to vector<384x128xbf16>
    %cst_11 = arith.constant dense<0.000000e+00> : vector<16x128xf32>
    %32 = tpu.matmul %29, %31, %cst_11 {dimension_numbers = #tpu.dot_dimension_numbers<[1], [0], [0], [1], [0, 0, 1, 1], [], []>} : vector<16x384xbf16>, vector<384x128xbf16>, vector<16x128xf32> -> vector<16x128xf32>
    %c0_12 = arith.constant 0 : index
    %c0_13 = arith.constant 0 : index
    %c0_14 = arith.constant 0 : index
    %33 = vector.load %arg3[%c0_12, %c0_13, %c0_14] : memref<2x1x128xf32, #tpu.memory_space<vmem>>, vector<1x1x128xf32>
    %34 = vector.shape_cast %33 : vector<1x1x128xf32> to vector<1x128xf32>
    %35 = vector.broadcast %34 : vector<1x128xf32> to vector<16x128xf32>
    %36 = arith.addf %32, %35 : vector<16x128xf32>
    %cst_15 = arith.constant 0.000000e+00 : f32
    %37 = vector.broadcast %cst_15 : f32 to vector<16x128xf32>
    %38 = arith.maximumf %36, %37 : vector<16x128xf32>
    %c1_i32_16 = arith.constant 1 : i32
    %39 = tpu.dynamic_rotate %38 by %c1_i32_16 dim 0 : vector<16x128xf32>, i32 -> vector<16x128xf32>
    %cst_17 = arith.constant 0.000000e+00 : f32
    %40 = vector.broadcast %cst_17 : f32 to vector<16x128xf32>
    %41 = arith.select %19, %40, %39 : vector<16x128xi1>, vector<16x128xf32>
    %c15_i32_18 = arith.constant 15 : i32
    %42 = tpu.dynamic_rotate %38 by %c15_i32_18 dim 0 : vector<16x128xf32>, i32 -> vector<16x128xf32>
    %cst_19 = arith.constant 0.000000e+00 : f32
    %43 = vector.broadcast %cst_19 : f32 to vector<16x128xf32>
    %44 = arith.select %21, %43, %42 : vector<16x128xi1>, vector<16x128xf32>
    %45 = tpu.concatenate %41, %38, %44 in 1 : vector<16x128xf32>, vector<16x128xf32>, vector<16x128xf32> -> vector<16x384xf32>
    %46 = arith.truncf %45 : vector<16x384xf32> to vector<16x384xbf16>
    %c1 = arith.constant 1 : index
    %c0_20 = arith.constant 0 : index
    %c0_21 = arith.constant 0 : index
    %47 = vector.load %arg2[%c1, %c0_20, %c0_21] : memref<2x384x128xbf16, #tpu.memory_space<vmem>>, vector<1x384x128xbf16>
    %48 = vector.shape_cast %47 : vector<1x384x128xbf16> to vector<384x128xbf16>
    %cst_22 = arith.constant dense<0.000000e+00> : vector<16x128xf32>
    %49 = tpu.matmul %46, %48, %cst_22 {dimension_numbers = #tpu.dot_dimension_numbers<[1], [0], [0], [1], [0, 0, 1, 1], [], []>} : vector<16x384xbf16>, vector<384x128xbf16>, vector<16x128xf32> -> vector<16x128xf32>
    %c1_23 = arith.constant 1 : index
    %c0_24 = arith.constant 0 : index
    %c0_25 = arith.constant 0 : index
    %50 = vector.load %arg3[%c1_23, %c0_24, %c0_25] : memref<2x1x128xf32, #tpu.memory_space<vmem>>, vector<1x1x128xf32>
    %51 = vector.shape_cast %50 : vector<1x1x128xf32> to vector<1x128xf32>
    %52 = vector.broadcast %51 : vector<1x128xf32> to vector<16x128xf32>
    %53 = arith.addf %49, %52 : vector<16x128xf32>
    %54 = arith.addf %53, %0 : vector<16x128xf32>
    %cst_26 = arith.constant 0.000000e+00 : f32
    %55 = vector.broadcast %cst_26 : f32 to vector<16x128xf32>
    %56 = arith.maximumf %54, %55 : vector<16x128xf32>
    %c0_27 = arith.constant 0 : index
    %c0_28 = arith.constant 0 : index
    %57 = vector.load %arg4[%c0_27, %c0_28] : memref<16x128xf32, #tpu.memory_space<vmem>>, vector<16x128xf32>
    tpu.vector_store %arg4[%c0_27, %c0_28], %56 {strides = array<i32>} : memref<16x128xf32, #tpu.memory_space<vmem>>, vector<16x128xf32>,
    return
  }
  func.func @transform_0(%arg0: i32) -> (i32, i32) {
    %c0_i32 = arith.constant 0 : i32
    %c0_i32_0 = arith.constant 0 : i32
    return %arg0, %c0_i32 : i32, i32
  }
  func.func @transform_1(%arg0: i32) -> (i32, i32, i32) {
    %c0_i32 = arith.constant 0 : i32
    %c0_i32_0 = arith.constant 0 : i32
    %c0_i32_1 = arith.constant 0 : i32
    %c0_i32_2 = arith.constant 0 : i32
    return %c0_i32, %c0_i32_0, %c0_i32_1 : i32, i32, i32
  }
  func.func @transform_2(%arg0: i32) -> (i32, i32, i32) {
    %c0_i32 = arith.constant 0 : i32
    %c0_i32_0 = arith.constant 0 : i32
    %c0_i32_1 = arith.constant 0 : i32
    %c0_i32_2 = arith.constant 0 : i32
    return %c0_i32, %c0_i32_0, %c0_i32_1 : i32, i32, i32
  }
  func.func @transform_3(%arg0: i32) -> (i32, i32) {
    %c0_i32 = arith.constant 0 : i32
    %c0_i32_0 = arith.constant 0 : i32
    return %arg0, %c0_i32 : i32, i32
  }
}

</mosaic_0001>

<bundles_post_ra>
// kernel: tpu_custom_call.1
= control target key start
LH: loop header
LB: loop body
LE: loop exit
PB: predicated region body
PF: predicated region fallthrough
CT: control target
= control target key end

     0   :  { %8 = vsyncpa [#allocation3], 0  ;;  %s1633_s0 = inlined_call_operand.hbm [shape: f32[32,128], index: 0, kind: input, shape index: {}]   ;;  %s1634_s1 = inlined_call_operand.hbm [shape: bf16[2,384,128], index: 1, kind: input, shape index: {}]   ;;  %s1635_s2 = inlined_call_operand.hbm [shape: f32[2,1,128], index: 2, kind: input, shape index: {}]   ;;  %s1636_s3 = inlined_call_operand.hbm [shape: f32[32,128], index: 3, kind: output, shape index: {}]  }
   0x1   :  { %10 = vsyncpa [#allocation3 + $0x1], 0 }
   0x2   :  { %11 = vsyncpa [#allocation6], 0 }
   0x3   :  { %12 = vsyncpa [#allocation4], 0 }
   0x4   :  { %14 = vsyncpa [#allocation4 + $0x1], 0  ;;  %s1434_s12 = smov 0   ;;  %s1436_s13 = smov 0  }
   0x5   :  { %s1438_s14 = smov 0   ;;  %s1440_s15 = smov 0  }
   0x6 LB: > { %s1455_s16 = sadd.s32 4294967295, %s1401_s15   ;;  %s885_s17 = sadd.s32 4294967294, %s1401_s15   ;;  %s1401_s15 = sphi %s1440_s15, %s1650_s15   ;;  %s1397_s14 = sphi %s1438_s14, %s1649_s14   ;;  %s1393_s13 = sphi %s1436_s13, %s1648_s13   ;;  %s1389_s12 = sphi %s1434_s12, %s1647_s12  }
   0x7   : > { %p40_p0 = scmp.ne.s32.totalorder %s1393_s13, %s1389_s12  ;;  %p41_p1 = scmp.eq.s32.totalorder %s1455_s16, 0 }
   0x8   : > { %p106_p2 = scmp.eq.s32.totalorder %s1455_s16, 1  ;;  %p112_p3 = scmp.eq.s32.totalorder %s885_s17, 1 }
   0x9   : > { %p1464_p4 = por %p41_p1, %p40_p0  ;;  %p886_p5 = scmp.ge.s32.totalorder %s1401_s15, 1 }
   0xa   : > { %p1469_p6 = por %p112_p3, %p40_p0  ;;  %p119_p7 = scmp.lt.s32.totalorder %s1401_s15, 3 }
   0xb   : > { %s130_s22 = sshll.u32 %s1634_s1, 4  ;;  %s1403_s24 = smov [#allocation5]   ;;  %s131_s22 = int_to_ptr.hbm [resolvable:$true] %s130_s22 }
   0xc   : > { %p1477_p8 = pnand %p886_p5, %p119_p7  ;;  %s132_s25 = sshll.u32 %s1403_s24, 4  ;;  %s133_s25 = int_to_ptr.vmem [resolvable:$true] %s132_s25 }
   0xd   : > { %s144_s28 = sshll.u32 %s1635_s2, 4  ;;  %s1404_s29 = smov 64   ;;  %s145_s28 = int_to_ptr.hbm [resolvable:$true] %s144_s28 }
   0xe   : > { %p1175_p9 = pneg %p1477_p8  ;;  %s1405_s30 = smov 4  }
   0xf   : > { %s1406_s4 = smov [#allocation7]   ;;  %s1407_s6 = smov 16  }
  0x10   : > { %p1176_p10 = pnand %p1175_p9, %p41_p1  ;;  %s146_s5 = sshll.u32 %s1406_s4, 4  ;;  %s147_s5 = int_to_ptr.vmem [resolvable:$true] %s146_s5 }
  0x11   : > { %s1408_s7 = smov 1   ;;  %s1490_s8 = sadd.s32 1, %s1401_s15  }
  0x12   : > { %1178 = dma.hbm_to_vmem [thread:$0]  (!%p1176_p10), %s131_s22, 6144, %s133_s25, [#allocation6], %s1404_s29, %s1404_s29, %s1405_s30  }
  0x13   : > { %1181 = dma.hbm_to_vmem [thread:$0]  (!%p1176_p10), %s145_s28, 32, %s147_s5, [#allocation6], %s1407_s6, %s1407_s6, %s1408_s7  }
  0x14   : > { %s24_s9 = ssub.s32 %s1401_s15, %s1490_s8  ;;  %s27_s10 = sadd.s32 1, %s1397_s14 }
  0x15   : > { %p25_p12 = scmp.eq.s32.totalorder %s24_s9, 0  ;;  %p34_p13 = scmp.ne.s32.totalorder %s1397_s14, %s1393_s13 }
  0x16   : > { %p35_p0 = scmp.eq.s32.totalorder %s1401_s15, 0  ;;  %p1192_p7 = scmp.lt.s32.totalorder %s1401_s15, 2 }
  0x17   : > { %s1499_s11 = scalar_select %p25_p12, %s1397_s14, %s27_s10  }
  0x18   : > { %p36_p3 = por %p35_p0, %p34_p13  ;;  %p1503_p5 = por %p106_p2, %p34_p13 }
  0x19   : > { %s160_s20 = sand.u32 1, %s1397_s14   ;;  %s1111_s22 = sshll.u32 %s1401_s15, 4 }
  0x1a   : > { %s890_s21 = sshll.u32 %s160_s20, 4  ;;  %s169_s26 = scalar_lea.hbm %s1633_s0, %s1111_s22 }
  0x1b   : > { %s164_s27 = scalar_lea.vmem [#allocation2], %s890_s21  ;;  %s170_s29 = sshll.u32 %s169_s26, 4  ;;  %s171_s29 = int_to_ptr.hbm [resolvable:$true] %s170_s29 }
  0x1c   : > { %s172_s28 = sshll.u32 %s164_s27, 4  ;;  %p1513_p9 = pnand %p1192_p7, %p36_p3  ;;  %s173_s28 = int_to_ptr.vmem [resolvable:$true] %s172_s28 }
  0x1d   : > { %s161_s4 = scalar_lea.sflag [#allocation3], %s160_s20  ;;  %s1301_s5 = sshra.s32 %s171_s29, 4  ;;  %s1302_s5 = int_to_ptr.hbm [resolvable:$true] %s1301_s5 }
  0x1e   : > { %s1303_s6 = scalar_lea.hbm %s1302_s5, 16  ;;  %p1305_p10 = pneg %p1513_p9 }
  0x1f   : > { %p1304_p2 = scmp.ne.s32.totalorder %s1302_s5, %s1303_s6  ;;  %s1308_s10 = scalar_lea.hbm %s1633_s0, 32 }
  0x20   : > { %p1309_p0 = scmp.lt.s32.totalorder %s1302_s5, %s1633_s0  ;;  %p1310_p3 = scmp.lt.s32.totalorder %s1308_s10, %s1303_s6 }
  0x21   : > { %p1306_p12 = pnand %p1305_p10, %p1304_p2 }
  0x22   : > { %p1311_p7 = por %p1310_p3, %p1309_p0 }
  0x23   : > { %p1307_p13 = pneg %p1306_p12 }
  0x25   : > { %p1312_p11 = pnand %p1311_p7, %p1307_p13 }
  0x27   : > { %1315 = shalt.err (!%p1312_p11)
}
  0x28   : > { %s1409_s20 = smov 128   ;;  %s1410_s24 = smov 8  }
  0x29   : > { %1185 = dma.hbm_to_vmem [thread:$0]  (!%p1513_p9), %s171_s29, 256, %s173_s28, %s161_s4, %s1409_s20, %s1409_s20, %s1410_s24  }
  0x2a   : > { %184 = sbr.rel (%p1477_p8) target bundleno = 387 (0x183), region = 32  ;;  %s1530_s25 = sand.u32 (!%p1477_p8), 1, %s1393_s13  }
  0x2b   : > { %s894_s26 = sshll.u32 (!%p1477_p8), %s1530_s25, 4  ;;  %s187_s27 = scalar_lea.sflag (!%p1477_p8), [#allocation3], %s1530_s25 }
  0x2c   : > { %s1536_s5 = scalar_lea.vmem (!%p1477_p8), [#allocation2], %s894_s26 }
  0x2f   : > { %1376 = dma.done.wait (%p1464_p4), %s187_s27, 256  }
  0x30   : > { %1378 = vsyncadd (%p1464_p4), %s187_s27, 4294967040 }
  0x31   : > { %1380 = dma.done.wait (%p41_p1), [#allocation6], 6176  }
  0x32   : > { %1382 = vsyncadd (%p41_p1), [#allocation6], 4294961120  ;;  %v1119_v0 = vld [vmem:[#allocation5 + $0x38] sm:$0xff]  ;;  %v1118_v3 = vld [vmem:[#allocation5 + $0x30] sm:$0xff]  ;;  %v228_v14 = vlaneseq  ;;  %vm1411_vm4 = vmmov 1   ;;  %s1160_s18 = sshll.u32 %s1455_s16, 4 }
  0x33   : > { %v1127_v1 = vld [vmem:[#allocation5 + $0x78] sm:$0xff]  ;;  %472 = vmatpush.bf16.msra.mxu0 %v1119_v0  ;;  %v1126_v4 = vld [vmem:[#allocation5 + $0x70] sm:$0xff]  ;;  %v1117_v6 = vld [vmem:[#allocation5 + $0x28] sm:$0xff]  ;;  %s789_s29 = scalar_lea.hbm %s1636_s3, %s1160_s18  ;;  %s223_s30 = scalar_lea.vmem [#allocation8], %s894_s26 }
  0x34   : > { %v1135_v2 = vld [vmem:[#allocation5 + $0xb8] sm:$0xff]  ;;  %486 = vmatpush.bf16.msra.mxu1 %v1127_v1  ;;  %v1134_v5 = vld [vmem:[#allocation5 + $0xb0] sm:$0xff]  ;;  %v1125_v7 = vld [vmem:[#allocation5 + $0x68] sm:$0xff]  ;;  %v1546_v18 = vshrl.u32 %v228_v14, 7  ;;  %s790_s4 = sshll.u32 %s223_s30, 4  ;;  %s792_s6 = sshll.u32 %s789_s29, 4  ;;  %s791_s4 = int_to_ptr.vmem [resolvable:$true] %s790_s4  ;;  %s793_s6 = int_to_ptr.hbm [resolvable:$true] %s792_s6 }
  0x35   : > { %500 = vmatpush.bf16.msra.mxu2 %v1135_v2  ;;  %v1133_v8 = vld [vmem:[#allocation5 + $0xa8] sm:$0xff]  ;;  %v1143_v9 = vld [vmem:[#allocation5 + $0xf8] sm:$0xff]  ;;  %v1116_v10 = vld [vmem:[#allocation5 + $0x20] sm:$0xff]  ;;  %s778_s16 = scalar_lea.sflag [#allocation4], %s1530_s25  ;;  %s1345_s7 = sshra.s32 %s793_s6, 4  ;;  %s1346_s7 = int_to_ptr.hbm [resolvable:$true] %s1345_s7 }
  0x36   : > { %v1124_v11 = vld [vmem:[#allocation5 + $0x60] sm:$0xff]  ;;  %729 = vmatpush.bf16.msra.mxu3 %v1143_v9  ;;  %v1142_v13 = vld [vmem:[#allocation5 + $0xf0] sm:$0xff]  ;;  %v1115_v15 = vld [vmem:[#allocation5 + $0x18] sm:$0xff]  ;;  %v230_v24 = vadd.s32 8, %v1546_v18  ;;  %v235_v30 = vand.u32 15, %v1546_v18  ;;  %vm261_vm0 = vcmp.lt.s32.totalorder %v1546_v18, 1  ;;  %p1352_p11 = scmp.lt.s32.totalorder %s1346_s7, %s1636_s3 }
  0x37   : > { %473 = vmatpush.bf16.msra.mxu0 %v1118_v3  ;;  %v1132_v12 = vld [vmem:[#allocation5 + $0xa0] sm:$0xff]  ;;  %v1123_v16 = vld [vmem:[#allocation5 + $0x58] sm:$0xff]  ;;  %v1114_v19 = vld [vmem:[#allocation5 + $0x10] sm:$0xff]  ;;  %vm268_vm1 = vcmp.lt.s32.totalorder %v1546_v18, 7  ;;  %s1347_s9 = scalar_lea.hbm %s1346_s7, 16  ;;  %s1351_s22 = scalar_lea.hbm %s1636_s3, 32 }
  0x38   : > { %487 = vmatpush.bf16.msra.mxu1 %v1126_v4  ;;  %v1131_v17 = vld [vmem:[#allocation5 + $0x98] sm:$0xff]  ;;  %v1122_v20 = vld [vmem:[#allocation5 + $0x50] sm:$0xff]  ;;  %v1113_v25 = vld [vmem:[#allocation5 + $0x8] sm:$0xff]  ;;  %v242_v33 = vand.u32 15, %v230_v24  ;;  %vm1161_vm2 = vcmp.ne.s32.totalorder %v235_v30, 0  ;;  %p1348_p1 = scmp.ne.s32.totalorder %s1346_s7, %s1347_s9  ;;  %p1353_p9 = scmp.lt.s32.totalorder %s1351_s22, %s1347_s9 }
  0x39   : > { %501 = vmatpush.bf16.msra.mxu2 %v1134_v5  ;;  %v1130_v21 = vld [vmem:[#allocation5 + $0x90] sm:$0xff]  ;;  %v1552_v23 = vld [vmem:[%s1536_s5 + $0x8] sm:$0xff]  ;;  %v1112_v34 = vld [vmem:[#allocation5] sm:$0xff] }
  0x3a   : > { %730 = vmatpush.bf16.msra.mxu3 %v1142_v13  ;;  %v1549_v22 = vld [vmem:[%s1536_s5] sm:$0xff]  ;;  %v1121_v26 = vld [vmem:[#allocation5 + $0x48] sm:$0xff]  ;;  %v260_v28 = vrot.slane %v1552_v23, 7  ;;  %v267_v32 = vrot.slane %v1552_v23, 1  ;;  %v1151_v41 = vld [vmem:[#allocation5 + $0x138] sm:$0xff]  ;;  %vm1162_vm3 = vcmp.ne.s32.totalorder %v242_v33, 15  ;;  %p1349_p4 = pnand %p1348_p1, %p1503_p5  ;;  %p1354_p2 = por %p1353_p9, %p1352_p11 }
  0x3b   : > { %474 = vmatpush.bf16.msra.mxu0 %v1117_v6  ;;  %v259_v27 = vrot.slane %v1549_v22, 7  ;;  %v1129_v29 = vld [vmem:[#allocation5 + $0x88] sm:$0xff]  ;;  %v266_v31 = vrot.slane %v1549_v22, 1  ;;  %v1120_v35 = vld [vmem:[#allocation5 + $0x40] sm:$0xff]  ;;  %v1159_v42 = vld [vmem:[#allocation5 + $0x178] sm:$0xff]  ;;  %v274_v44 = vpack.c.bf16 %v1552_v23, %v1549_v22 }
  0x3c   : > { %488 = vmatpush.bf16.msra.mxu1 %v1125_v7  ;;  %v1128_v38 = vld [vmem:[#allocation5 + $0x80] sm:$0xff]  ;;  %vm1572_vm5 = vmpackc.low %vm1411_vm4, %vm1161_vm2  ;;  %v1150_v48 = vld [vmem:[#allocation5 + $0x130] sm:$0xff]  ;;  %p1350_p8 = pneg %p1349_p4 }
  0x3d   : > { %502 = vmatpush.bf16.msra.mxu2 %v1133_v8  ;;  %v262_v36 = vsel %vm261_vm0, %v259_v27, %v260_v28  ;;  %v263_v37 = vsel %vm261_vm0, %v260_v28, %v259_v27  ;;  %v269_v39 = vsel %vm268_vm1, %v266_v31, %v267_v32  ;;  %v270_v40 = vsel %vm268_vm1, %v267_v32, %v266_v31  ;;  %vm1576_vm6 = vmpackc.low %vm1162_vm3, %vm1411_vm4  ;;  %v1158_v49 = vld [vmem:[#allocation5 + $0x170] sm:$0xff]  ;;  %v1149_v50 = vld [vmem:[#allocation5 + $0x128] sm:$0xff] }
  0x3e   : > { %v996_v43 = vpack.c.bf16 %v262_v36, %v263_v37  ;;  %v1000_v46 = vpack.c.bf16 %v270_v40, %v269_v39  ;;  %v1141_v51 = vld [vmem:[#allocation5 + $0xe8] sm:$0xff]  ;;  %v1148_v53 = vld [vmem:[#allocation5 + $0x120] sm:$0xff]  ;;  %v1147_v56 = vld [vmem:[#allocation5 + $0x118] sm:$0xff]  ;;  %p1355_p10 = pnand %p1354_p2, %p1350_p8 }
  0x3f   : > { %475 = vmatpush.bf16.msra.mxu0 %v1116_v10  ;;  %v1157_v52 = vld [vmem:[#allocation5 + $0x168] sm:$0xff]  ;;  %731 = vmatpush.bf16.msra.mxu3 %v1141_v51  ;;  %v1140_v54 = vld [vmem:[#allocation5 + $0xe0] sm:$0xff]  ;;  %v1139_v57 = vld [vmem:[#allocation5 + $0xd8] sm:$0xff] }
  0x40   : > { %489 = vmatpush.bf16.msra.mxu1 %v1124_v11  ;;  %v1156_v55 = vld [vmem:[#allocation5 + $0x160] sm:$0xff]  ;;  %v1155_v58 = vld [vmem:[#allocation5 + $0x158] sm:$0xff]  ;;  %v1146_v59 = vld [vmem:[#allocation5 + $0x110] sm:$0xff] }
  0x41   : > { %503 = vmatpush.bf16.msra.mxu2 %v1132_v12  ;;  %v1138_v60 = vld [vmem:[#allocation5 + $0xd0] sm:$0xff]  ;;  %v1145_v62 = vld [vmem:[#allocation5 + $0x108] sm:$0xff]  ;;  %v1144_v1 = vld [vmem:[#allocation5 + $0x100] sm:$0xff] }
  0x42   : > { %v1154_v61 = vld [vmem:[#allocation5 + $0x150] sm:$0xff]  ;;  %v1137_v63 = vld [vmem:[#allocation5 + $0xc8] sm:$0xff]  ;;  %v1136_v2 = vld [vmem:[#allocation5 + $0xc0] sm:$0xff] }
  0x43   : > { %476 = vmatpush.bf16.msra.mxu0 %v1115_v15  ;;  %732 = vmatpush.bf16.msra.mxu3 %v1140_v54  ;;  %v1153_v0 = vld [vmem:[#allocation5 + $0x148] sm:$0xff]  ;;  %v1152_v3 = vld [vmem:[#allocation5 + $0x140] sm:$0xff] }
  0x44   : > { %490 = vmatpush.bf16.msra.mxu1 %v1123_v16  ;;  %v1239_v4 = vld [vmem:[#allocation7] ss:$0 sm:$0xff]  ;;  %v1240_v33 = vld [vmem:[#allocation7 + $0x1] ss:$0 sm:$0xff] }
  0x45   : > { %504 = vmatpush.bf16.msra.mxu2 %v1131_v17 }
  0x47   : > { %477 = vmatpush.bf16.msra.mxu0 %v1114_v19  ;;  %733 = vmatpush.bf16.msra.mxu3 %v1139_v57 }
  0x48   : > { %491 = vmatpush.bf16.msra.mxu1 %v1122_v20 }
  0x49   : > { %505 = vmatpush.bf16.msra.mxu2 %v1130_v21 }
  0x4b   : > { %478 = vmatpush.bf16.msra.mxu0 %v1113_v25  ;;  %734 = vmatpush.bf16.msra.mxu3 %v1138_v60 }
  0x4c   : > { %492 = vmatpush.bf16.msra.mxu1 %v1121_v26 }
  0x4d   : > { %506 = vmatpush.bf16.msra.mxu2 %v1129_v29 }
  0x4f   : > { %479 = vmatpush.bf16.msra.mxu0 %v1112_v34  ;;  %735 = vmatpush.bf16.msra.mxu3 %v1137_v63 }
  0x50   : > { %493 = vmatpush.bf16.msra.mxu1 %v1120_v35 }
  0x51   : > { %507 = vmatpush.bf16.msra.mxu2 %v1128_v38 }
  0x52   : > { %997 = vmatmul.msk.bf16.vlgmr.msra.gmra.mxu0 %vm1572_vm5, %v996_v43 }
  0x53   : > { %743 = vmatpush.bf16.msrb.mxu0 %v1151_v41  ;;  %494 = vmatmul.bf16.vlgmr.msra.gmra.mxu1 %v274_v44 }
  0x54   : > { %757 = vmatpush.bf16.msrb.mxu1 %v1159_v42  ;;  %1001 = vmatmul.msk.bf16.vlgmr.msra.gmra.mxu2 %vm1576_vm6, %v1000_v46 }
  0x55   : > { %736 = vmatpush.bf16.msra.mxu3 %v1136_v2 }
  0x57   : > { %744 = vmatpush.bf16.msrb.mxu0 %v1150_v48 }
  0x58   : > { %758 = vmatpush.bf16.msrb.mxu1 %v1158_v49 }
  0x5b   : > { %745 = vmatpush.bf16.msrb.mxu0 %v1149_v50 }
  0x5c   : > { %759 = vmatpush.bf16.msrb.mxu1 %v1157_v52 }
  0x5f   : > { %746 = vmatpush.bf16.msrb.mxu0 %v1148_v53 }
  0x60   : > { %760 = vmatpush.bf16.msrb.mxu1 %v1156_v55 }
  0x63   : > { %747 = vmatpush.bf16.msrb.mxu0 %v1147_v56 }
  0x64   : > { %761 = vmatpush.bf16.msrb.mxu1 %v1155_v58 }
  0x67   : > { %748 = vmatpush.bf16.msrb.mxu0 %v1146_v59 }
  0x68   : > { %762 = vmatpush.bf16.msrb.mxu1 %v1154_v61 }
  0x6b   : > { %749 = vmatpush.bf16.msrb.mxu0 %v1145_v62 }
  0x6c   : > { %763 = vmatpush.bf16.msrb.mxu1 %v1153_v0 }
  0x6f   : > { %750 = vmatpush.bf16.msrb.mxu0 %v1144_v1 }
  0x70   : > { %764 = vmatpush.bf16.msrb.mxu1 %v1152_v3 }
  0xcf   : > { %v481_v5 = vpop.f32.mrf.mxu0 }
  0xd0   : > { %v482_v6 = vadd.f32 %v1239_v4, %v481_v5  ;;  %v495_v7 = vpop.f32.mrf.mxu1 }
  0xd2   : > { %v496_v8 = vadd.f32 %v495_v7, %v482_v6 }
  0xd7   : > { %v509_v9 = vpop.f32.mrf.mxu2  ;;  %v483_v10 = vpop.f32.mrf.mxu0 }
  0xd8   : > { %v484_v11 = vadd.f32 %v1239_v4, %v483_v10  ;;  %v510_v12 = vadd.f32 %v509_v9, %v496_v8  ;;  %v497_v13 = vpop.f32.mrf.mxu1 }
  0xda   : > { %v498_v14 = vadd.f32 %v497_v13, %v484_v11  ;;  %v514_v15 = vmax.f32 %v510_v12, 0.0 }
  0xdc   : > { %v516_v20 = vrot.slane %v514_v15, 7  ;;  %v522_v21 = vrot.slane %v514_v15, 1 }
  0xdf   : > { %v511_v16 = vpop.f32.mrf.mxu2 }
  0xe0   : > { %v512_v17 = vadd.f32 %v511_v16, %v498_v14 }
  0xe2   : > { %v515_v19 = vmax.f32 %v512_v17, 0.0 }
  0xe4   : > { %v517_v24 = vrot.slane %v515_v19, 7  ;;  %v523_v25 = vrot.slane %v515_v19, 1  ;;  %v529_v26 = vpack.c.bf16 %v515_v19, %v514_v15 }
  0xe6   : > { %751 = vmatmul.bf16.vlgmr.msrb.gmra.mxu0 %v529_v26  ;;  %v518_v27 = vsel %vm261_vm0, %v516_v20, %v517_v24  ;;  %v519_v28 = vsel %vm261_vm0, %v517_v24, %v516_v20  ;;  %v524_v29 = vsel %vm268_vm1, %v522_v21, %v523_v25  ;;  %v525_v30 = vsel %vm268_vm1, %v523_v25, %v522_v21 }
  0xe7   : > { %v1100_v31 = vpack.c.bf16 %v518_v27, %v519_v28  ;;  %v1104_v32 = vpack.c.bf16 %v525_v30, %v524_v29 }
  0xe9   : > { %1101 = vmatmul.msk.bf16.vlgmr.msra.gmra.mxu3 %vm1572_vm5, %v1100_v31  ;;  %1105 = vmatmul.msk.bf16.vlgmr.msrb.gmra.mxu1 %vm1576_vm6, %v1104_v32 }
 0x163   : > { %v752_v34 = vpop.f32.mrf.mxu0 }
 0x166   : > { %v766_v37 = vpop.f32.mrf.mxu1 }
 0x16b   : > { %v754_v43 = vpop.f32.mrf.mxu0 }
 0x16c   : > { %v738_v35 = vpop.f32.mrf.mxu3 }
 0x16d   : > { %v739_v36 = vadd.f32 %v1240_v33, %v738_v35 }
 0x16e   : > { %v768_v45 = vpop.f32.mrf.mxu1 }
 0x16f   : > { %v753_v38 = vadd.f32 %v752_v34, %v739_v36 }
 0x171   : > { %v767_v39 = vadd.f32 %v766_v37, %v753_v38 }
 0x173   : > { %v771_v40 = vadd.f32 %v767_v39, %v1549_v22 }
 0x174   : > { %v740_v18 = vpop.f32.mrf.mxu3 }
 0x175   : > { %v773_v41 = vmax.f32 %v771_v40, 0.0  ;;  %v741_v42 = vadd.f32 %v1240_v33, %v740_v18 }
 0x177   : > { %775 = vst [vmem:[%s223_s30] sm:$0xff] %v773_v41  ;;  %v755_v44 = vadd.f32 %v754_v43, %v741_v42 }
 0x179   : > { %v769_v46 = vadd.f32 %v768_v45, %v755_v44 }
 0x17b   : > { %v772_v22 = vadd.f32 %v769_v46, %v1552_v23 }
 0x17d   : > { %v774_v47 = vmax.f32 %v772_v22, 0.0 }
 0x17f   : > { %776 = vst [vmem:[%s223_s30 + $0x8] sm:$0xff] %v774_v47 }
 0x180   : > { %1358 = shalt.err (!%p1355_p10)
}
 0x181   : > { %s1412_s25 = smov 128   ;;  %s1413_s26 = smov 8  }
 0x182   : > { %1173 = dma.vmem_to_hbm [thread:$0]  (%p1503_p5), %s791_s4, 256, %s793_s6, %s778_s16, %s1412_s25, %s1412_s25, %s1413_s26  }
 0x183 PF: > { %s807_s27 = sand.u32 1, %s1389_s12   ;;  %p1646_p12 = scmp.ge.s32.totalorder %s1401_s15, 2 }
 0x184   : > { %s808_s5 = scalar_lea.sflag [#allocation4], %s807_s27 }
 0x185   : > { %p1187_p13 = pnand %p1646_p12, %p1469_p6 }
 0x187   : > { %p1188_p0 = pneg %p1187_p13 }
 0x189   : > { %1384 = dma.done.wait (%p1188_p0), %s808_s5, 256  }
 0x18a   : > { %1386 = vsyncadd (%p1188_p0), %s808_s5, 4294967040  ;;  %p17_p3 = scmp.ge.s32.totalorder %s1490_s8, 4   ;;  %s1647_s12 = smov %s1393_s13 }
 0x18b   : > { %s1648_s13 = smov %s1397_s14  ;;  %s1649_s14 = smov %s1499_s11 }
 0x18c   : > { %s1650_s15 = smov %s1490_s8  ;;  %19 = sbr.rel (!%p17_p3) target bundleno = 6 (0x6), region = 87 }
 0x191   :  { %814 = vsyncpa [#allocation3], 1 }
 0x192   :  { %816 = vsyncpa [#allocation3 + $0x1], 1 }
 0x193   :  { %817 = vsyncpa [#allocation6], 1 }
 0x194   :  { %818 = vsyncpa [#allocation4], 1 }
 0x195   :  { %820 = vsyncpa [#allocation4 + $0x1], 1 }

</bundles_post_ra>
